<compile_context>
chip_gen: v6e
topology: v6e:2x2x1
jax: 0.10.0
libtpu: 0.0.40
codegen_flags: <defaults>
</compile_context>

<pallas_src>
import jax
import jax.numpy as jnp
from jax.experimental import pallas as pl
from jax.experimental.pallas import tpu as pltpu


def _postprocess_kernel(logits_ref, bbox_ref, scale_ref,
                        scores_ref, labels_ref, boxes_ref):
    # logits_ref: (TB, Q, C1)   bbox_ref: (TB, Q, 4)   scale_ref: (TB, 1, 4)
    # scores_ref: (TB, 1, Q)    labels_ref: (TB, 1, Q) boxes_ref: (TB, Q, 4)
    logits = logits_ref[...].astype(jnp.float32)            # (TB, Q, C1)
    C1 = logits.shape[-1]

    # ---- scores / labels without materializing the full softmax ----
    # softmax is monotone, so argmax(prob[..., :-1]) == argmax(logits[..., :-1]),
    # and max(prob[..., :-1]) == exp(max_fg - max_all) / sum(exp(logits - max_all)).
    fg = logits[..., : C1 - 1]                               # (TB, Q, C)
    m_all = jnp.max(logits, axis=-1)                         # (TB, Q)
    denom = jnp.sum(jnp.exp(logits - m_all[..., None]), axis=-1)   # (TB, Q)
    m_fg = jnp.max(fg, axis=-1)                              # (TB, Q)
    scores = jnp.exp(m_fg - m_all) / denom                   # exact divide

    idx = jax.lax.broadcasted_iota(jnp.int32, fg.shape, 2)
    labels = jnp.min(jnp.where(fg == m_fg[..., None], idx, C1 - 1),
                     axis=-1)                                # first max index

    scores_ref[...] = scores[:, None, :]                     # lane-dense (TB,1,Q)
    labels_ref[...] = labels[:, None, :].astype(jnp.int32)

    # ---- cxcywh -> xyxy, scaled by [imgW, imgH, imgW, imgH] ----
    b = bbox_ref[...].astype(jnp.float32)                    # (TB, Q, 4)
    c = b[..., 0:2]                                          # (cx, cy)
    wh = b[..., 2:4]                                         # (w, h)
    xyxy = jnp.concatenate([c - 0.5 * wh, c + 0.5 * wh], axis=-1)
    boxes_ref[...] = xyxy * scale_ref[...]                   # broadcast (TB,1,4)


def _choose_batch_tile(B, Q, C1, logits_dtype, bbox_dtype,
                       budget_bytes=6 * 1024 * 1024):
    """Largest batch tile whose double-buffered block footprint fits the budget."""
    l_item = jnp.dtype(logits_dtype).itemsize
    b_item = jnp.dtype(bbox_dtype).itemsize

    def block_bytes(tb):
        in_b = tb * Q * C1 * l_item + tb * Q * 4 * b_item + tb * 4 * 4
        out_b = tb * (Q * 4 + 2 * Q) * 4
        return 2 * (in_b + out_b)          # x2 for double buffering

    if block_bytes(B) <= budget_bytes:
        return B                           # single grid step (common case)
    for tb in range(B - 1, 0, -1):
        if B % tb == 0 and block_bytes(tb) <= budget_bytes:
            return tb
    return 1


def postprocess(logits, bboxes, img_size):
    """logits [B,Q,C+1], bboxes [B,Q,4], img_size [B,2].

    Returns stacked arrays (scores [B,Q] f32, labels [B,Q] int32, boxes [B,Q,4] f32)
    matching the PyTorch PostProcess math; use `to_per_image_list` for the
    list-of-dicts container of the original module.
    """
    B, Q, C1 = logits.shape
    img_w = img_size[:, 0].astype(jnp.float32)
    img_h = img_size[:, 1].astype(jnp.float32)
    scale = jnp.stack([img_w, img_h, img_w, img_h], axis=1)[:, None, :]   # (B,1,4)

    tb = _choose_batch_tile(B, Q, C1, logits.dtype, bboxes.dtype)
    grid = (B // tb,)

    scores, labels, boxes = pl.pallas_call(
        _postprocess_kernel,
        out_shape=(
            jax.ShapeDtypeStruct((B, 1, Q), jnp.float32),
            jax.ShapeDtypeStruct((B, 1, Q), jnp.int32),
            jax.ShapeDtypeStruct((B, Q, 4), jnp.float32),
        ),
        grid=grid,
        in_specs=[
            pl.BlockSpec((tb, Q, C1), lambda i: (i, 0, 0)),
            pl.BlockSpec((tb, Q, 4), lambda i: (i, 0, 0)),
            pl.BlockSpec((tb, 1, 4), lambda i: (i, 0, 0)),
        ],
        out_specs=(
            pl.BlockSpec((tb, 1, Q), lambda i: (i, 0, 0)),
            pl.BlockSpec((tb, 1, Q), lambda i: (i, 0, 0)),
            pl.BlockSpec((tb, Q, 4), lambda i: (i, 0, 0)),
        ),
        compiler_params=pltpu.CompilerParams(
            dimension_semantics=("parallel",),
            vmem_limit_bytes=32 * 1024 * 1024),
    )(logits, bboxes, scale)

    return scores[:, 0, :], labels[:, 0, :], boxes


def to_per_image_list(scores, labels, boxes):
    # Optional PyTorch-parity container (per-image dicts); slices are lazy views.
    return [{"scores": scores[i], "labels": labels[i], "boxes": boxes[i]}
            for i in range(scores.shape[0])]


def _reference(logits, bboxes, img_size):
    prob = jax.nn.softmax(logits, axis=-1)
    scores = jnp.max(prob[..., :-1], axis=-1)
    labels = jnp.argmax(prob[..., :-1], axis=-1).astype(jnp.int32)
    cx, cy, w, h = (bboxes[..., 0], bboxes[..., 1], bboxes[..., 2], bboxes[..., 3])
    boxes = jnp.stack([cx - 0.5 * w, cy - 0.5 * h, cx + 0.5 * w, cy + 0.5 * h], -1)
    img_w, img_h = img_size[:, 0], img_size[:, 1]
    scale = jnp.stack([img_w, img_h, img_w, img_h], 1)[:, None, :]
    return scores, labels, boxes * scale


if __name__ == "__main__":
    B, Q, C1 = 2, 8, 32          # batch=2, queries=8, 31 classes + 1 no-object
    key = jax.random.PRNGKey(0)
    k1, k2, k3 = jax.random.split(key, 3)
    logits = jax.random.normal(k1, (B, Q, C1), dtype=jnp.float32)
    bboxes = jax.random.uniform(k2, (B, Q, 4), dtype=jnp.float32)
    img_size = jax.random.uniform(k3, (B, 2), dtype=jnp.float32,
                                  minval=200.0, maxval=800.0)

    got_scores, got_labels, got_boxes = postprocess(logits, bboxes, img_size)
    jax.block_until_ready((got_scores, got_labels, got_boxes))

    ref_scores, ref_labels, ref_boxes = _reference(logits, bboxes, img_size)

    assert jnp.allclose(got_scores, ref_scores, atol=1e-5, rtol=1e-5)
    assert jnp.array_equal(got_labels, ref_labels)
    assert jnp.allclose(got_boxes, ref_boxes, atol=1e-4, rtol=1e-5)

    # PyTorch-parity container still available.
    _ = to_per_image_list(got_scores, got_labels, got_boxes)

    print("KERNEL_OK")
</pallas_src>

<mosaic_0001>
module attributes {stable_mosaic.version = 11 : i64} {
  func.func @_postprocess_kernel(%arg0: i32, %arg1: memref<2x8x32xf32, #tpu.memory_space<vmem>>, %arg2: memref<2x8x4xf32, #tpu.memory_space<vmem>>, %arg3: memref<2x1x4xf32, #tpu.memory_space<vmem>>, %arg4: memref<2x1x8xf32, #tpu.memory_space<vmem>>, %arg5: memref<2x1x8xi32, #tpu.memory_space<vmem>>, %arg6: memref<2x8x4xf32, #tpu.memory_space<vmem>>) attributes {dimension_semantics = [#tpu.dimension_semantics<parallel>], iteration_bounds = array<i64: 1>, scalar_prefetch = 0 : i64, scratch_operands = 0 : i64, tpu.core_type = #tpu.core_type<tc>, window_params = [{transform_indices = @transform_0, window_bounds = array<i64: 2, 8, 32>}, {transform_indices = @transform_1, window_bounds = array<i64: 2, 8, 4>}, {transform_indices = @transform_2, window_bounds = array<i64: 2, 1, 4>}, {transform_indices = @transform_3, window_bounds = array<i64: 2, 1, 8>}, {transform_indices = @transform_4, window_bounds = array<i64: 2, 1, 8>}, {transform_indices = @transform_5, window_bounds = array<i64: 2, 8, 4>}]} {
    %c0 = arith.constant 0 : index
    %c0_0 = arith.constant 0 : index
    %c0_1 = arith.constant 0 : index
    %0 = vector.load %arg1[%c0, %c0_0, %c0_1] : memref<2x8x32xf32, #tpu.memory_space<vmem>>, vector<2x8x32xf32>
    %1 = vector.extract_strided_slice %0 {offsets = [0, 0, 0], sizes = [2, 8, 31], strides = [1, 1, 1]} : vector<2x8x32xf32> to vector<2x8x31xf32>
    %cst = arith.constant dense<0xFF800000> : vector<2x8xf32>
    %2 = vector.multi_reduction <maximumf>, %0, %cst [2] : vector<2x8x32xf32> to vector<2x8xf32>
    %3 = vector.shape_cast %2 : vector<2x8xf32> to vector<2x8x1xf32>
    %4 = vector.broadcast %3 : vector<2x8x1xf32> to vector<2x8x32xf32>
    %5 = arith.subf %0, %4 : vector<2x8x32xf32>
    %6 = math.exp %5 : vector<2x8x32xf32>
    %cst_2 = arith.constant dense<0.000000e+00> : vector<2x8xf32>
    %7 = vector.multi_reduction <add>, %6, %cst_2 [2] : vector<2x8x32xf32> to vector<2x8xf32>
    %cst_3 = arith.constant dense<0xFF800000> : vector<2x8xf32>
    %8 = vector.multi_reduction <maximumf>, %1, %cst_3 [2] : vector<2x8x31xf32> to vector<2x8xf32>
    %9 = arith.subf %8, %2 : vector<2x8xf32>
    %10 = math.exp %9 : vector<2x8xf32>
    %11 = arith.divf %10, %7 : vector<2x8xf32>
    %12 = tpu.iota {dimensions = array<i32: 2>} : vector<2x8x31xi32>
    %13 = vector.shape_cast %8 : vector<2x8xf32> to vector<2x8x1xf32>
    %14 = vector.broadcast %13 : vector<2x8x1xf32> to vector<2x8x31xf32>
    %15 = arith.cmpf oeq, %1, %14 : vector<2x8x31xf32>
    %c31_i32 = arith.constant 31 : i32
    %16 = vector.broadcast %c31_i32 : i32 to vector<2x8x31xi32>
    %17 = arith.select %15, %12, %16 : vector<2x8x31xi1>, vector<2x8x31xi32>
    %cst_4 = arith.constant dense<2147483647> : vector<2x8xi32>
    %18 = vector.multi_reduction <minsi>, %17, %cst_4 [2] : vector<2x8x31xi32> to vector<2x8xi32>
    %19 = vector.shape_cast %11 : vector<2x8xf32> to vector<2x1x8xf32>
    %c0_5 = arith.constant 0 : index
    %c0_6 = arith.constant 0 : index
    %c0_7 = arith.constant 0 : index
    %20 = vector.load %arg4[%c0_5, %c0_6, %c0_7] : memref<2x1x8xf32, #tpu.memory_space<vmem>>, vector<2x1x8xf32>
    tpu.vector_store %arg4[%c0_5, %c0_6, %c0_7], %19 {strides = array<i32>} : memref<2x1x8xf32, #tpu.memory_space<vmem>>, vector<2x1x8xf32>,
    %21 = vector.shape_cast %18 : vector<2x8xi32> to vector<2x1x8xi32>
    %c0_8 = arith.constant 0 : index
    %c0_9 = arith.constant 0 : index
    %c0_10 = arith.constant 0 : index
    %22 = vector.load %arg5[%c0_8, %c0_9, %c0_10] : memref<2x1x8xi32, #tpu.memory_space<vmem>>, vector<2x1x8xi32>
    tpu.vector_store %arg5[%c0_8, %c0_9, %c0_10], %21 {strides = array<i32>} : memref<2x1x8xi32, #tpu.memory_space<vmem>>, vector<2x1x8xi32>,
    %c0_11 = arith.constant 0 : index
    %c0_12 = arith.constant 0 : index
    %c0_13 = arith.constant 0 : index
    %23 = vector.load %arg2[%c0_11, %c0_12, %c0_13] : memref<2x8x4xf32, #tpu.memory_space<vmem>>, vector<2x8x4xf32>
    %24 = vector.extract_strided_slice %23 {offsets = [0, 0, 0], sizes = [2, 8, 2], strides = [1, 1, 1]} : vector<2x8x4xf32> to vector<2x8x2xf32>
    %25 = vector.extract_strided_slice %23 {offsets = [0, 0, 2], sizes = [2, 8, 2], strides = [1, 1, 1]} : vector<2x8x4xf32> to vector<2x8x2xf32>
    %cst_14 = arith.constant 5.000000e-01 : f32
    %26 = vector.broadcast %cst_14 : f32 to vector<2x8x2xf32>
    %27 = arith.mulf %26, %25 : vector<2x8x2xf32>
    %28 = arith.subf %24, %27 : vector<2x8x2xf32>
    %cst_15 = arith.constant 5.000000e-01 : f32
    %29 = vector.broadcast %cst_15 : f32 to vector<2x8x2xf32>
    %30 = arith.mulf %29, %25 : vector<2x8x2xf32>
    %31 = arith.addf %24, %30 : vector<2x8x2xf32>
    %32 = tpu.concatenate %28, %31 in 2 : vector<2x8x2xf32>, vector<2x8x2xf32> -> vector<2x8x4xf32>
    %c0_16 = arith.constant 0 : index
    %c0_17 = arith.constant 0 : index
    %c0_18 = arith.constant 0 : index
    %33 = vector.load %arg3[%c0_16, %c0_17, %c0_18] : memref<2x1x4xf32, #tpu.memory_space<vmem>>, vector<2x1x4xf32>
    %34 = vector.broadcast %33 : vector<2x1x4xf32> to vector<2x8x4xf32>
    %35 = arith.mulf %32, %34 : vector<2x8x4xf32>
    %c0_19 = arith.constant 0 : index
    %c0_20 = arith.constant 0 : index
    %c0_21 = arith.constant 0 : index
    %36 = vector.load %arg6[%c0_19, %c0_20, %c0_21] : memref<2x8x4xf32, #tpu.memory_space<vmem>>, vector<2x8x4xf32>
    tpu.vector_store %arg6[%c0_19, %c0_20, %c0_21], %35 {strides = array<i32>} : memref<2x8x4xf32, #tpu.memory_space<vmem>>, vector<2x8x4xf32>,
    return
  }
  func.func @transform_0(%arg0: i32) -> (i32, i32, i32) {
    %c0_i32 = arith.constant 0 : i32
    %c0_i32_0 = arith.constant 0 : i32
    %c0_i32_1 = arith.constant 0 : i32
    return %arg0, %c0_i32, %c0_i32_0 : i32, i32, i32
  }
  func.func @transform_1(%arg0: i32) -> (i32, i32, i32) {
    %c0_i32 = arith.constant 0 : i32
    %c0_i32_0 = arith.constant 0 : i32
    %c0_i32_1 = arith.constant 0 : i32
    return %arg0, %c0_i32, %c0_i32_0 : i32, i32, i32
  }
  func.func @transform_2(%arg0: i32) -> (i32, i32, i32) {
    %c0_i32 = arith.constant 0 : i32
    %c0_i32_0 = arith.constant 0 : i32
    %c0_i32_1 = arith.constant 0 : i32
    return %arg0, %c0_i32, %c0_i32_0 : i32, i32, i32
  }
  func.func @transform_3(%arg0: i32) -> (i32, i32, i32) {
    %c0_i32 = arith.constant 0 : i32
    %c0_i32_0 = arith.constant 0 : i32
    %c0_i32_1 = arith.constant 0 : i32
    return %arg0, %c0_i32, %c0_i32_0 : i32, i32, i32
  }
  func.func @transform_4(%arg0: i32) -> (i32, i32, i32) {
    %c0_i32 = arith.constant 0 : i32
    %c0_i32_0 = arith.constant 0 : i32
    %c0_i32_1 = arith.constant 0 : i32
    return %arg0, %c0_i32, %c0_i32_0 : i32, i32, i32
  }
  func.func @transform_5(%arg0: i32) -> (i32, i32, i32) {
    %c0_i32 = arith.constant 0 : i32
    %c0_i32_0 = arith.constant 0 : i32
    %c0_i32_1 = arith.constant 0 : i32
    return %arg0, %c0_i32, %c0_i32_0 : i32, i32, i32
  }
}

</mosaic_0001>

<bundles_post_ra>
// kernel: tpu_custom_call.1
= control target key start
LH: loop header
LB: loop body
LE: loop exit
PB: predicated region body
PF: predicated region fallthrough
CT: control target
= control target key end

     0   :  { %11 = vsyncpa [#allocation3], 0  ;;  %vm40_vm0 = vcmask 252928   ;;  %vm21_vm1 = vcmask 261120   ;;  %s373_s0 = inlined_call_operand.vmem [shape: f32[2,8,32], index: 0, kind: input, shape index: {}]   ;;  %s374_s1 = inlined_call_operand.vmem [shape: f32[2,8,4], index: 1, kind: input, shape index: {}]   ;;  %s375_s2 = inlined_call_operand.vmem [shape: f32[2,1,4], index: 2, kind: input, shape index: {}]   ;;  %s376_s3 = inlined_call_operand.hbm [shape: f32[2,1,8], index: 3, kind: output, shape index: {0}]   ;;  %s377_s4 = inlined_call_operand.hbm [shape: s32[2,1,8], index: 4, kind: output, shape index: {1}]   ;;  %s378_s5 = inlined_call_operand.vmem [shape: f32[2,8,4], index: 5, kind: output, shape index: {2}]  }
   0x1   :  { %v19_v0 = vld [vmem:[%s373_s0] sm:$0xff]  ;;  %v20_v1 = vld [vmem:[%s373_s0 + $0x8] sm:$0xff] }
   0x2   :  { %12 = vsyncpa [#allocation5], 0  ;;  %v41_v2 = vsel %vm40_vm0, %v19_v0, -inf  ;;  %v22_v3 = vsel %vm21_vm1, %v19_v0, -inf  ;;  %v44_v4 = vsel %vm40_vm0, %v20_v1, -inf  ;;  %v25_v5 = vsel %vm21_vm1, %v20_v1, -inf }
   0x3   :  { %42 = vmax.xlane.f32.xlu0 %v41_v2  ;;  %23 = vmax.xlane.f32.xlu1 %v22_v3  ;;  %v57_v6 = vlaneseq  ;;  %v320_v20 = vld [vmem:[%s374_s1 + $0x8] sm:$0xff]  ;;  %v325_v21 = vld [vmem:[%s374_s1] sm:$0xff]  ;;  %s264_s25 = smov 126   ;;  %s265_s1 = smov 2   ;;  %vm105_vm6 = vcmask 57344  }
   0x4   :  { %v121_v22 = vmul.f32 0.5, %v320_v20  ;;  %v120_v23 = vmul.f32 0.5, %v325_v21  ;;  %s266_s26 = smov [#allocation2]  }
   0x5   :  { %v311_v7 = vand.u32 127, %v57_v6  ;;  %v96_v50 = vshrl.u32 %v57_v6, 7  ;;  %s169_s27 = sshll.u32 %s266_s26, 4  ;;  %s170_s27 = int_to_ptr.vmem [resolvable:$true] %s169_s27 }
   0x6   :  { %s220_s28 = scalar_lea.vmem %s170_s27, 32  ;;  %p225_p1 = scmp.lt.s32.totalorder %s170_s27, %s170_s27 }
   0x7   :  { %45 = vmax.xlane.f32.xlu0 %v44_v4  ;;  %26 = vmax.xlane.f32.xlu1 %v25_v5  ;;  %v97_v52 = vsub.s32 %v311_v7, %v96_v50  ;;  %p221_p0 = scmp.ne.s32.totalorder %s170_s27, %s220_s28  ;;  %p226_p2 = scmp.lt.s32.totalorder %s220_s28, %s220_s28 }
   0x9   :  { %p227_p3 = por %p226_p2, %p225_p1 }
   0xb   :  { %p228_p4 = pnand %p227_p3, %p221_p0 }
  0x8c   :  { %v43_v8 = vpop.xlane.xlu0 %42  ;;  %v24_v9 = vpop.xlane.xlu1 %23 }
  0x8d   :  { %vm59_vm2 = vcmp.eq.f32.partialorder %v19_v0, %v43_v8  ;;  %v47_v10 = vsub.f32 %v43_v8, %v24_v9  ;;  %v28_v26 = vsub.f32 %v19_v0, %v24_v9 }
  0x8e   :  { %v61_v11 = vsel %vm59_vm2, %v311_v7, 31 }
  0x8f   :  { %v63_v12 = vsel %vm40_vm0, %v61_v11, 2147483647  ;;  %v30_v28 = vmul.f32 1.442695, %v28_v26  ;;  %v49_v47 = vmul.f32 1.442695, %v47_v10 }
  0x90   :  { %v46_v13 = vpop.xlane.xlu0 %45  ;;  %v65_v14 = vshra.s32 %v63_v12, 16  ;;  %v27_v24 = vpop.xlane.xlu1 %26  ;;  %v64_v33 = vand.u32 65535, %v63_v12 }
  0x91   :  { %vm60_vm3 = vcmp.eq.f32.partialorder %v20_v1, %v46_v13  ;;  %v29_v25 = vsub.f32 %v20_v1, %v27_v24  ;;  %v48_v45 = vsub.f32 %v46_v13, %v27_v24 }
  0x92   :  { %v62_v15 = vsel %vm60_vm3, %v311_v7, 31  ;;  %v67_v16 = vcvt.s32.f32 %v65_v14  ;;  %v66_v35 = vcvt.s32.f32 %v64_v33 }
  0x93   :  { %v78_v17 = vsel %vm40_vm0, %v62_v15, 2147483647  ;;  %v32_v27 = vmul.f32 1.442695, %v29_v25  ;;  %v51_v46 = vmul.f32 1.442695, %v48_v45 }
  0x94   :  { %68 = vmin.xlane.f32.xlu0 %v67_v16  ;;  %v80_v18 = vshra.s32 %v78_v17, 16  ;;  %v79_v36 = vand.u32 65535, %v78_v17 }
  0x95   :  { %208 = vpow2.f32 %v32_v27 }
  0x96   :  { %v82_v19 = vcvt.s32.f32 %v80_v18  ;;  %210 = vpow2.f32 %v30_v28  ;;  %v81_v39 = vcvt.s32.f32 %v79_v36 }
  0x97   :  { %212 = vpow2.f32 %v51_v46 }
  0x98   :  { %83 = vmin.xlane.f32.xlu1 %v82_v19 }
  0xa2   :  { %v209_v29 = vpop.eup %208 }
  0xa3   :  { %v37_v30 = vsel %vm21_vm1, %v209_v29, 0.0  ;;  %v211_v31 = vpop.eup %210 }
  0xa4   :  { %v34_v32 = vsel %vm21_vm1, %v211_v31, 0.0  ;;  %v213_v51 = vpop.eup %212 }
  0xa9   :  { %126 = vrot.lane.b32.xlu1 %v121_v22, %s264_s25 }
  0xaa   :  { %124 = vrot.lane.b32.xlu0 %v120_v23, %s264_s25 }
  0xc9   :  { %38 = vadd.xlane.f32.xlu0 %v37_v30 }
  0xcd   :  { %35 = vadd.xlane.f32.xlu1 %v34_v32 }
 0x11d   :  { %v69_v34 = vpop.xlane.xlu0 %68 }
 0x11e   :  { %vm70_vm4 = vcmp.eq.f32.partialorder %v67_v16, %v69_v34 }
 0x11f   :  { %v71_v37 = vsel %vm70_vm4, %v66_v35, inf }
 0x120   :  { %72 = vmin.xlane.f32.xlu0 %v71_v37 }
 0x121   :  { %v84_v38 = vpop.xlane.xlu1 %83  ;;  %v125_v42 = vpop.permute.xlu0 %124 }
 0x122   :  { %vm85_vm5 = vcmp.eq.f32.partialorder %v82_v19, %v84_v38  ;;  %v132_v44 = vadd.f32 %v125_v42, %v325_v21 }
 0x123   :  { %v86_v40 = vsel %vm85_vm5, %v81_v39, inf }
 0x124   :  { %87 = vmin.xlane.f32.xlu1 %v86_v40 }
 0x125   :  { %v331_v41 = vpop.permute.xlu1 %126 }
 0x126   :  { %v133_v43 = vadd.f32 %v331_v41, %v320_v20 }
 0x135   :  { %138 = vrot.lane.b32.xlu1 %v133_v43, %s265_s1 }
 0x136   :  { %136 = vrot.lane.b32.xlu0 %v132_v44, %s265_s1 }
 0x152   :  { %v39_v48 = vpop.xlane.xlu0 %38 }
 0x153   :  { %214 = vrcp.f32 %v39_v48 }
 0x154   :  { %216 = vpow2.f32 %v49_v47 }
 0x156   :  { %v36_v49 = vpop.xlane.xlu1 %35 }
 0x157   :  { %218 = vrcp.f32 %v36_v49 }
 0x160   :  { %v215_v53 = vpop.eup %214 }
 0x161   :  { %v56_v54 = vmul.f32 %v215_v53, %v213_v51  ;;  %v217_v55 = vpop.eup %216 }
 0x163   :  { %v102_v56 = vrot.slane %v56_v54, %v97_v52 }
 0x164   :  { %v219_v57 = vpop.eup %218 }
 0x165   :  { %v54_v58 = vmul.f32 %v219_v57, %v217_v55  ;;  %107 = vst.msk [vmem:[#allocation2 + $0x1] sm:$0x1] %vm105_vm6, %v102_v56 }
 0x167   :  { %v98_v59 = vrot.slane %v54_v58, %v97_v52 }
 0x169   :  { %106 = vst.msk [vmem:[#allocation2] sm:$0x1] %vm105_vm6, %v98_v59 }
 0x16a   :  { %231 = shalt.err (!%p228_p4)
}
 0x16b   :  { %s267_s29 = smov 16   ;;  %s268_s30 = smov 1   ;;  %v75_v60 = vcvt.f32.s32 %v69_v34  ;;  %v90_v61 = vcvt.f32.s32 %v84_v38  ;;  %vm142_vm7 = vcmask 15360   ;;  %v130_v1 = vsub.f32 %v325_v21, %v125_v42  ;;  %v200_v3 = vld [vmem:[%s375_s2] ss:$0 sm:$0xff] }
 0x16c   :  { %175 = dma.vmem_to_hbm [thread:$0]  %s170_s27, 32, %s376_s3, [#allocation3], %s267_s29, %s267_s29, %s268_s30   ;;  %vm161_vm8 = vcmask 31744   ;;  %v131_v11 = vsub.f32 %v320_v20, %v331_v41 }
 0x16d   :  { %v76_v63 = vshll.u32 %v75_v60, 16  ;;  %v91_v4 = vshll.u32 %v90_v61, 16  ;;  %s269_s3 = smov [#allocation4]   ;;  %v201_v13 = vld [vmem:[%s375_s2 + $0x1] ss:$0 sm:$0xff] }
 0x16e   :  { %s181_s10 = sshll.u32 %s269_s3, 4  ;;  %s182_s10 = int_to_ptr.vmem [resolvable:$true] %s181_s10 }
 0x16f   :  { %s240_s17 = scalar_lea.vmem %s182_s10, 32  ;;  %p245_p6 = scmp.lt.s32.totalorder %s182_s10, %s182_s10 }
 0x170   :  { %p241_p5 = scmp.ne.s32.totalorder %s182_s10, %s240_s17  ;;  %p246_p7 = scmp.lt.s32.totalorder %s240_s17, %s240_s17 }
 0x172   :  { %p247_p8 = por %p246_p7, %p245_p6 }
 0x174   :  { %p248_p9 = pnand %p247_p8, %p241_p5 }
 0x1a9   :  { %v73_v62 = vpop.xlane.xlu0 %72 }
 0x1aa   :  { %v74_v0 = vcvt.f32.s32 %v73_v62 }
 0x1ac   :  { %v77_v2 = vadd.s32 %v76_v63, %v74_v0 }
 0x1ad   :  { %v137_v5 = vpop.permute.xlu0 %136  ;;  %v88_v6 = vpop.xlane.xlu1 %87 }
 0x1ae   :  { %v111_v7 = vrot.slane %v77_v2, %v97_v52  ;;  %v143_v8 = vsel %vm142_vm7, %v130_v1, %v137_v5  ;;  %v89_v9 = vcvt.f32.s32 %v88_v6 }
 0x1af   :  { %v159_v10 = vmul.f32 %v200_v3, %v143_v8 }
 0x1b0   :  { %116 = vst.msk [vmem:[#allocation4] sm:$0x1] %vm105_vm6, %v111_v7  ;;  %v92_v12 = vadd.s32 %v91_v4, %v89_v9 }
 0x1b1   :  { %162 = vst.msk [vmem:[%s378_s5] sm:$0xff] %vm161_vm8, %v159_v10  ;;  %v139_v14 = vpop.permute.xlu1 %138 }
 0x1b2   :  { %v115_v15 = vrot.slane %v92_v12, %v97_v52  ;;  %v144_v16 = vsel %vm142_vm7, %v131_v11, %v139_v14 }
 0x1b3   :  { %v160_v17 = vmul.f32 %v201_v13, %v144_v16 }
 0x1b4   :  { %117 = vst.msk [vmem:[#allocation4 + $0x1] sm:$0x1] %vm105_vm6, %v115_v15 }
 0x1b5   :  { %163 = vst.msk [vmem:[%s378_s5 + $0x8] sm:$0xff] %vm161_vm8, %v160_v17 }
 0x1b6   :  { %251 = shalt.err (!%p248_p9)
}
 0x1b7   :  { %187 = dma.vmem_to_hbm [thread:$0]  %s182_s10, 32, %s377_s4, [#allocation5], %s267_s29, %s267_s29, %s268_s30  }
 0x1b8   :  { %260 = dma.done.wait [#allocation3], 32  }
 0x1b9   :  { %261 = vsyncadd [#allocation3], 4294967264 }
 0x1ba   :  { %262 = dma.done.wait [#allocation5], 32  }
 0x1bb   :  { %263 = vsyncadd [#allocation5], 4294967264 }
 0x1bc   :  { %198 = vsyncpa [#allocation3], 1 }
 0x1bd   :  { %199 = vsyncpa [#allocation5], 1 }

</bundles_post_ra>
